<compile_context>
chip_gen: v6e
topology: v6e:2x2x1
jax: 0.10.0
libtpu: 0.0.40
codegen_flags: <defaults>
</compile_context>

<pallas_src>
import functools

import jax
import jax.numpy as jnp
from jax import lax
from jax.experimental import pallas as pl
from jax.experimental.pallas import tpu as pltpu

P_DROP = 0.1
_KEEP_SCALE = 1.0 / (1.0 - P_DROP)
# Drop an element when unsigned(hash) < this threshold  ->  P(drop) ~= 0.1.
_DROP_THRESHOLD = int(round(P_DROP * float(1 << 32)))   # 429496730 (< 2**31)


def _to_i32(v):
    """Python int -> value with the same 32-bit pattern, representable as int32."""
    v &= 0xFFFFFFFF
    return v - (1 << 32) if v >= (1 << 31) else v


# murmur3-style mixing constants (int32 bit patterns of the usual u32 constants).
_C_A = _to_i32(0x9E3779B1)
_C_B = _to_i32(0x85EBCA6B)
_C_C = _to_i32(0xC2B2AE35)


def _keep_mask(rows, cols, hidden, seed):
    """Deterministic per-element keep mask.

    All arithmetic is int32 with wraparound (bit-identical to the uint32 murmur mix),
    shifts are logical, and the final unsigned compare `u32(bits) >= T` (T < 2**31) is
    expressed in signed form as `(bits < 0) | (bits >= T)`.  Only int32 ops -> lowers
    on every TPU generation and in interpret mode.
    """
    idx = rows * hidden + cols
    bits = idx * jnp.int32(_C_A) + seed
    bits = (bits ^ lax.shift_right_logical(bits, jnp.int32(16))) * jnp.int32(_C_B)
    bits = (bits ^ lax.shift_right_logical(bits, jnp.int32(13))) * jnp.int32(_C_C)
    bits = bits ^ lax.shift_right_logical(bits, jnp.int32(16))
    return (bits < 0) | (bits >= jnp.int32(_DROP_THRESHOLD))


def _erf_f32(z):
    """float32 erf, Abramowitz & Stegun 7.1.26 (|abs err| < 1.5e-7)."""
    a1, a2, a3, a4, a5 = (0.254829592, -0.284496736, 1.421413741,
                          -1.453152027, 1.061405429)
    p = 0.3275911
    az = jnp.abs(z)
    t = 1.0 / (1.0 + p * az)
    poly = ((((a5 * t + a4) * t + a3) * t + a2) * t + a1) * t
    e = poly * jnp.exp(-az * az)
    return jnp.where(z < 0.0, e - 1.0, 1.0 - e)


def _gelu_exact(h):
    # Matches torch.nn.GELU() default (erf-based), to float32 accuracy.
    return 0.5 * h * (1.0 + _erf_f32(h * 0.7071067811865476))


def _fc_act_drop_kernel(seed_ref, x_ref, w_ref, b_ref, o_ref):
    # x_ref: (tm, H) f32    w_ref: (H, H) bf16, torch [out, in] layout
    # b_ref: (1, H)  f32    o_ref: (tm, H) f32 (aliased with x's HBM buffer)
    tm, hidden = x_ref.shape

    x = x_ref[...]                                       # f32, kept for the residual

    # Linear: x @ W^T + b.  bf16 operands feed the MXU at full rate (v6e/v7x),
    # f32 accumulation via preferred_element_type; contraction dims fold the transpose.
    h = lax.dot_general(
        x.astype(jnp.bfloat16), w_ref[...],
        dimension_numbers=(((1,), (1,)), ((), ())),
        preferred_element_type=jnp.float32,
    ) + b_ref[...]

    a = _gelu_exact(h)

    # Dropout(p=0.1), training semantics.  Stateless counter-based RNG keyed on
    # (seed, global element index) -> safe under "parallel" grid semantics.
    row0 = pl.program_id(0) * tm
    rows = lax.broadcasted_iota(jnp.int32, (tm, hidden), 0) + row0
    cols = lax.broadcasted_iota(jnp.int32, (tm, hidden), 1)
    keep = _keep_mask(rows, cols, hidden, seed_ref[0])
    dropped = jnp.where(keep, a * jnp.float32(_KEEP_SCALE), jnp.float32(0.0))

    o_ref[...] = (x + dropped).astype(o_ref.dtype)


@functools.partial(jax.jit, static_argnames=("tm",))
def fc_act_drop(x, weight, bias, seed, *, tm=512):
    """y = x + dropout(gelu(x @ W^T + b), p=0.1), training-mode dropout.

    x: (B, S, H) f32; weight: (H, H) torch layout [out, in]; bias: (H,); seed: int.
    """
    B, S, H = x.shape
    M = B * S

    # Row tile: big enough to fill the MXU and amortize per-step DMA/step overhead,
    # clamped so the f32 x/out double buffers stay modest when H is large, and clamped
    # to the actual row count for small inputs.  Keep the sublane dim 8-aligned.
    tm_cap = max(256, ((4 << 20) // (H * 4)) // 8 * 8)
    tm_eff = min(tm, tm_cap, M)
    if tm_eff >= 8:
        tm_eff = (tm_eff // 8) * 8
    pad = (-M) % tm_eff
    M_pad = M + pad

    x2 = x.reshape(M, H)
    if pad:
        x2 = jnp.pad(x2, ((0, pad), (0, 0)))

    w_bf = weight.astype(jnp.bfloat16)                  # cast once: halves W traffic
    b2 = bias.reshape(1, H).astype(jnp.float32)
    seed_arr = jnp.reshape(jnp.asarray(seed, dtype=jnp.int32), (1,))

    # VMEM budget: resident bf16 weight (+double-buffer slack) + double-buffered f32
    # x/out tiles + bias.  Raise the scoped limit instead of shrinking the row tile.
    # TODO(synk): for very large H (v7x: bf16 W alone > ~32 MiB) switch to a K-tiled
    # reduction grid with an f32 VMEM accumulator instead of keeping W fully resident.
    need = 2 * H * H * 2 + 2 * 2 * tm_eff * H * 4 + 2 * H * 4 + (2 << 20)
    vmem_limit = int(min(max(need, 32 << 20), 64 << 20))

    out = pl.pallas_call(
        _fc_act_drop_kernel,
        out_shape=jax.ShapeDtypeStruct((M_pad, H), x.dtype),
        grid_spec=pltpu.PrefetchScalarGridSpec(
            num_scalar_prefetch=1,
            grid=(M_pad // tm_eff,),
            in_specs=[
                pl.BlockSpec((tm_eff, H), lambda i, s: (i, 0)),   # x row tile
                pl.BlockSpec((H, H), lambda i, s: (0, 0)),        # W (resident, bf16)
                pl.BlockSpec((1, H), lambda i, s: (0, 0)),        # bias
            ],
            out_specs=pl.BlockSpec((tm_eff, H), lambda i, s: (i, 0)),
        ),
        # Input index 1 (x2; index 0 is the scalar-prefetch seed) aliases output 0:
        # identical shape/dtype/index_map, full-tile write, so reuse x2's HBM buffer.
        input_output_aliases={1: 0},
        compiler_params=pltpu.CompilerParams(
            # Mask is a pure function of (seed, element index) -> row tiles are
            # order-independent, so shard the grid across v7x's two TensorCores.
            dimension_semantics=("parallel",),
            vmem_limit_bytes=vmem_limit,
        ),
    )(seed_arr, x2, w_bf, b2)

    if pad:
        out = out[:M]
    return out.reshape(B, S, H)


def _reference(x, weight, bias, seed):
    """Pure-JAX reference: f32 matmul + exact GELU + the same deterministic mask."""
    B, S, H = x.shape
    x2 = x.reshape(-1, H).astype(jnp.float32)
    h = x2 @ weight.T.astype(jnp.float32) + bias.astype(jnp.float32)
    a = jax.nn.gelu(h, approximate=False)
    M = x2.shape[0]
    rows = lax.broadcasted_iota(jnp.int32, (M, H), 0)
    cols = lax.broadcasted_iota(jnp.int32, (M, H), 1)
    keep = _keep_mask(rows, cols, H, jnp.int32(seed))
    y = x2 + jnp.where(keep, a * jnp.float32(_KEEP_SCALE), jnp.float32(0.0))
    return y.reshape(B, S, H)


if __name__ == "__main__":
    key = jax.random.PRNGKey(0)
    kx, kw, kb = jax.random.split(key, 3)

    B, S, H = 2, 8, 128   # input_size = H = 128
    x = jax.random.normal(kx, (B, S, H), dtype=jnp.float32)
    # Deterministic "Linear(input_size, input_size)" parameters (torch layout: [out, in]).
    limit = float(H) ** -0.5
    weight = jax.random.uniform(kw, (H, H), dtype=jnp.float32, minval=-limit, maxval=limit)
    bias = jax.random.uniform(kb, (H,), dtype=jnp.float32, minval=-limit, maxval=limit)

    y = fc_act_drop(x, weight, bias, seed=1234)
    jax.block_until_ready(y)

    assert y.shape == (B, S, H) and y.dtype == jnp.float32
    y_ref = _reference(x, weight, bias, 1234)
    # bf16 matmul operands + polynomial erf -> small, bounded deviation from the f32 ref.
    assert bool(jnp.all(jnp.isfinite(y)))
    assert bool(jnp.allclose(y, y_ref, atol=5e-2, rtol=5e-2)), \
        float(jnp.max(jnp.abs(y - y_ref)))
    # TODO(synk): the dropout mask is a deterministic counter-based hash of
    # (seed, element index); it matches torch's Bernoulli(0.9)/scale semantics but not
    # torch's RNG bit stream.
    print("KERNEL_OK")
</pallas_src>

<mosaic_0001>
module attributes {stable_mosaic.version = 11 : i64} {
  func.func @_fc_act_drop_kernel(%arg0: i32, %arg1: memref<1xi32, #tpu.memory_space<smem>>, %arg2: memref<16x128xf32, #tpu.memory_space<vmem>>, %arg3: memref<128x128xbf16, #tpu.memory_space<vmem>>, %arg4: memref<1x128xf32, #tpu.memory_space<vmem>>, %arg5: memref<16x128xf32, #tpu.memory_space<vmem>>) attributes {dimension_semantics = [#tpu.dimension_semantics<parallel>], iteration_bounds = array<i64: 1>, scalar_prefetch = 1 : i64, scratch_operands = 0 : i64, tpu.core_type = #tpu.core_type<tc>, window_params = [{transform_indices = @transform_0, window_bounds = array<i64: 16, 128>}, {pipeline_mode = #tpu.pipeline_mode<synchronous>, transform_indices = @transform_1, window_bounds = array<i64: 128, 128>}, {pipeline_mode = #tpu.pipeline_mode<synchronous>, transform_indices = @transform_2, window_bounds = array<i64: 1, 128>}, {transform_indices = @transform_3, window_bounds = array<i64: 16, 128>}]} {
    %c0 = arith.constant 0 : index
    %c0_0 = arith.constant 0 : index
    %0 = vector.load %arg2[%c0, %c0_0] : memref<16x128xf32, #tpu.memory_space<vmem>>, vector<16x128xf32>
    %1 = arith.truncf %0 : vector<16x128xf32> to vector<16x128xbf16>
    %c0_1 = arith.constant 0 : index
    %c0_2 = arith.constant 0 : index
    %2 = vector.load %arg3[%c0_1, %c0_2] : memref<128x128xbf16, #tpu.memory_space<vmem>>, vector<128x128xbf16>
    %cst = arith.constant dense<0.000000e+00> : vector<16x128xf32>
    %3 = tpu.matmul %1, %2, %cst {dimension_numbers = #tpu.dot_dimension_numbers<[1], [1], [0], [0], [0, 0, 1, 0], [], []>} : vector<16x128xbf16>, vector<128x128xbf16>, vector<16x128xf32> -> vector<16x128xf32>
    %c0_3 = arith.constant 0 : index
    %c0_4 = arith.constant 0 : index
    %4 = vector.load %arg4[%c0_3, %c0_4] : memref<1x128xf32, #tpu.memory_space<vmem>>, vector<1x128xf32>
    %5 = vector.broadcast %4 : vector<1x128xf32> to vector<16x128xf32>
    %6 = arith.addf %3, %5 : vector<16x128xf32>
    %cst_5 = arith.constant 5.000000e-01 : f32
    %7 = vector.broadcast %cst_5 : f32 to vector<16x128xf32>
    %8 = arith.mulf %7, %6 : vector<16x128xf32>
    %cst_6 = arith.constant 0.707106769 : f32
    %9 = vector.broadcast %cst_6 : f32 to vector<16x128xf32>
    %10 = arith.mulf %6, %9 : vector<16x128xf32>
    %11 = math.absf %10 : vector<16x128xf32>
    %cst_7 = arith.constant 0.327591091 : f32
    %12 = vector.broadcast %cst_7 : f32 to vector<16x128xf32>
    %13 = arith.mulf %12, %11 : vector<16x128xf32>
    %cst_8 = arith.constant 1.000000e+00 : f32
    %14 = vector.broadcast %cst_8 : f32 to vector<16x128xf32>
    %15 = arith.addf %14, %13 : vector<16x128xf32>
    %cst_9 = arith.constant 1.000000e+00 : f32
    %16 = vector.broadcast %cst_9 : f32 to vector<16x128xf32>
    %17 = arith.divf %16, %15 : vector<16x128xf32>
    %cst_10 = arith.constant 1.06140542 : f32
    %18 = vector.broadcast %cst_10 : f32 to vector<16x128xf32>
    %19 = arith.mulf %18, %17 : vector<16x128xf32>
    %cst_11 = arith.constant -1.45315206 : f32
    %20 = vector.broadcast %cst_11 : f32 to vector<16x128xf32>
    %21 = arith.addf %19, %20 : vector<16x128xf32>
    %22 = arith.mulf %21, %17 : vector<16x128xf32>
    %cst_12 = arith.constant 1.42141378 : f32
    %23 = vector.broadcast %cst_12 : f32 to vector<16x128xf32>
    %24 = arith.addf %22, %23 : vector<16x128xf32>
    %25 = arith.mulf %24, %17 : vector<16x128xf32>
    %cst_13 = arith.constant -0.284496725 : f32
    %26 = vector.broadcast %cst_13 : f32 to vector<16x128xf32>
    %27 = arith.addf %25, %26 : vector<16x128xf32>
    %28 = arith.mulf %27, %17 : vector<16x128xf32>
    %cst_14 = arith.constant 0.254829586 : f32
    %29 = vector.broadcast %cst_14 : f32 to vector<16x128xf32>
    %30 = arith.addf %28, %29 : vector<16x128xf32>
    %31 = arith.mulf %30, %17 : vector<16x128xf32>
    %cst_15 = arith.constant 0.000000e+00 : f32
    %32 = vector.broadcast %cst_15 : f32 to vector<16x128xf32>
    %33 = arith.subf %32, %11 : vector<16x128xf32>
    %34 = arith.mulf %33, %11 : vector<16x128xf32>
    %35 = math.exp %34 : vector<16x128xf32>
    %36 = arith.mulf %31, %35 : vector<16x128xf32>
    %cst_16 = arith.constant 0.000000e+00 : f32
    %37 = vector.broadcast %cst_16 : f32 to vector<16x128xf32>
    %38 = arith.cmpf olt, %10, %37 : vector<16x128xf32>
    %cst_17 = arith.constant 1.000000e+00 : f32
    %39 = vector.broadcast %cst_17 : f32 to vector<16x128xf32>
    %40 = arith.subf %36, %39 : vector<16x128xf32>
    %cst_18 = arith.constant 1.000000e+00 : f32
    %41 = vector.broadcast %cst_18 : f32 to vector<16x128xf32>
    %42 = arith.subf %41, %36 : vector<16x128xf32>
    %43 = arith.select %38, %40, %42 : vector<16x128xi1>, vector<16x128xf32>
    %cst_19 = arith.constant 1.000000e+00 : f32
    %44 = vector.broadcast %cst_19 : f32 to vector<16x128xf32>
    %45 = arith.addf %44, %43 : vector<16x128xf32>
    %46 = arith.mulf %8, %45 : vector<16x128xf32>
    %c16_i32 = arith.constant 16 : i32
    %47 = arith.muli %arg0, %c16_i32 : i32
    %48 = tpu.iota {dimensions = array<i32: 0>} : vector<16x128xi32>
    %49 = vector.broadcast %47 : i32 to vector<16x128xi32>
    %50 = arith.addi %48, %49 : vector<16x128xi32>
    %51 = tpu.iota {dimensions = array<i32: 1>} : vector<16x128xi32>
    %c0_20 = arith.constant 0 : index
    %52 = memref.load %arg1[%c0_20] : memref<1xi32, #tpu.memory_space<smem>>
    %c128_i32 = arith.constant 128 : i32
    %53 = vector.broadcast %c128_i32 : i32 to vector<16x128xi32>
    %54 = arith.muli %50, %53 : vector<16x128xi32>
    %55 = arith.addi %54, %51 : vector<16x128xi32>
    %c-1640531535_i32 = arith.constant -1640531535 : i32
    %56 = vector.broadcast %c-1640531535_i32 : i32 to vector<16x128xi32>
    %57 = arith.muli %55, %56 : vector<16x128xi32>
    %58 = vector.broadcast %52 : i32 to vector<16x128xi32>
    %59 = arith.addi %57, %58 : vector<16x128xi32>
    %c16_i32_21 = arith.constant 16 : i32
    %60 = vector.broadcast %c16_i32_21 : i32 to vector<16x128xi32>
    %61 = arith.shrui %59, %60 : vector<16x128xi32>
    %62 = arith.xori %59, %61 : vector<16x128xi32>
    %c-2048144789_i32 = arith.constant -2048144789 : i32
    %63 = vector.broadcast %c-2048144789_i32 : i32 to vector<16x128xi32>
    %64 = arith.muli %62, %63 : vector<16x128xi32>
    %c13_i32 = arith.constant 13 : i32
    %65 = vector.broadcast %c13_i32 : i32 to vector<16x128xi32>
    %66 = arith.shrui %64, %65 : vector<16x128xi32>
    %67 = arith.xori %64, %66 : vector<16x128xi32>
    %c-1028477387_i32 = arith.constant -1028477387 : i32
    %68 = vector.broadcast %c-1028477387_i32 : i32 to vector<16x128xi32>
    %69 = arith.muli %67, %68 : vector<16x128xi32>
    %c16_i32_22 = arith.constant 16 : i32
    %70 = vector.broadcast %c16_i32_22 : i32 to vector<16x128xi32>
    %71 = arith.shrui %69, %70 : vector<16x128xi32>
    %72 = arith.xori %69, %71 : vector<16x128xi32>
    %c0_i32 = arith.constant 0 : i32
    %73 = vector.broadcast %c0_i32 : i32 to vector<16x128xi32>
    %74 = arith.cmpi slt, %72, %73 : vector<16x128xi32>
    %c429496730_i32 = arith.constant 429496730 : i32
    %75 = vector.broadcast %c429496730_i32 : i32 to vector<16x128xi32>
    %76 = arith.cmpi sge, %72, %75 : vector<16x128xi32>
    %77 = arith.ori %74, %76 : vector<16x128xi1>
    %cst_23 = arith.constant 1.11111116 : f32
    %78 = vector.broadcast %cst_23 : f32 to vector<16x128xf32>
    %79 = arith.mulf %46, %78 : vector<16x128xf32>
    %cst_24 = arith.constant 0.000000e+00 : f32
    %80 = vector.broadcast %cst_24 : f32 to vector<16x128xf32>
    %81 = arith.select %77, %79, %80 : vector<16x128xi1>, vector<16x128xf32>
    %82 = arith.addf %0, %81 : vector<16x128xf32>
    %c0_25 = arith.constant 0 : index
    %c0_26 = arith.constant 0 : index
    %83 = vector.load %arg5[%c0_25, %c0_26] : memref<16x128xf32, #tpu.memory_space<vmem>>, vector<16x128xf32>
    tpu.vector_store %arg5[%c0_25, %c0_26], %82 {strides = array<i32>} : memref<16x128xf32, #tpu.memory_space<vmem>>, vector<16x128xf32>,
    return
  }
  func.func @transform_0(%arg0: i32, %arg1: memref<1xi32, #tpu.memory_space<smem>>) -> (i32, i32) {
    %c0_i32 = arith.constant 0 : i32
    %c0_i32_0 = arith.constant 0 : i32
    return %arg0, %c0_i32 : i32, i32
  }
  func.func @transform_1(%arg0: i32, %arg1: memref<1xi32, #tpu.memory_space<smem>>) -> (i32, i32) {
    %c0_i32 = arith.constant 0 : i32
    %c0_i32_0 = arith.constant 0 : i32
    %c0_i32_1 = arith.constant 0 : i32
    return %c0_i32, %c0_i32_0 : i32, i32
  }
  func.func @transform_2(%arg0: i32, %arg1: memref<1xi32, #tpu.memory_space<smem>>) -> (i32, i32) {
    %c0_i32 = arith.constant 0 : i32
    %c0_i32_0 = arith.constant 0 : i32
    %c0_i32_1 = arith.constant 0 : i32
    return %c0_i32, %c0_i32_0 : i32, i32
  }
  func.func @transform_3(%arg0: i32, %arg1: memref<1xi32, #tpu.memory_space<smem>>) -> (i32, i32) {
    %c0_i32 = arith.constant 0 : i32
    %c0_i32_0 = arith.constant 0 : i32
    return %arg0, %c0_i32 : i32, i32
  }
}

</mosaic_0001>

<bundles_post_ra>
// kernel: fc_act_drop.1
= control target key start
LH: loop header
LB: loop body
LE: loop exit
PB: predicated region body
PF: predicated region fallthrough
CT: control target
= control target key end

     0   :  { %v297_v0 = vmov 0.0   ;;  %vm298_vm0 = vmmov 0   ;;  %v187_v12 = vlaneseq  ;;  %s390_s2 = inlined_call_operand.vmem [shape: bf16[128,128], index: 2, kind: input, shape index: {}]   ;;  %s391_s1 = inlined_call_operand.vmem [shape: f32[16,128], index: 1, kind: input, shape index: {}, may-alias: {1,4}]   ;;  %s392_s3 = inlined_call_operand.vmem [shape: f32[1,128], index: 3, kind: input, shape index: {}]   ;;  %s393_s0 = inlined_call_operand.<no memory space> [shape: s32[1], index: 0, kind: input, shape index: {}]   ;;  %s394_s4 = inlined_call_operand.vmem [shape: f32[16,128], index: 4, kind: output, shape index: {}, may-alias: {1,4}]  }
   0x1   :  { %259 = vmatprep.subr.bf16.mxu0 %v297_v0  ;;  %v281_v1 = vld [vmem:[%s390_s2 + $0x38] sm:$0xff]   ;;  %275 = vmatprep.mubr.msk.bf16.mxu0 %vm298_vm0, %v297_v0  ;;  %v282_v2 = vld [vmem:[%s390_s2 + $0x30] sm:$0xff]   ;;  %v283_v3 = vld [vmem:[%s390_s2 + $0x28] sm:$0xff]   ;;  %v202_v33 = vstv %s393_s0 }
   0x2   :  { %260 = vmatpush3.bf16.xpose.msra.mxu0 %v281_v1  ;;  %v284_v4 = vld [vmem:[%s390_s2 + $0x20] sm:$0xff]   ;;  %v285_v5 = vld [vmem:[%s390_s2 + $0x18] sm:$0xff]   ;;  %v286_v6 = vld [vmem:[%s390_s2 + $0x10] sm:$0xff]   ;;  %v188_v13 = vshrl.u32 %v187_v12, 7  ;;  %v194_v17 = vand.u32 127, %v187_v12 }
   0x3   :  { %261 = vmatprep.subr.bf16.mxu0 %v297_v0  ;;  %v287_v7 = vld [vmem:[%s390_s2 + $0x8] sm:$0xff]   ;;  %v288_v8 = vld [vmem:[%s390_s2] sm:$0xff]  }
   0x4   :  { %v351_v9 = vld [vmem:[%s391_s1] sm:$0xff]  ;;  %v356_v10 = vld [vmem:[%s391_s1 + $0x8] sm:$0xff]  ;;  %v189_v15 = vadd.s32 8, %v188_v13  ;;  %v196_v18 = vmul.u32 128, %v188_v13 }
   0x5   :  { %v19_v11 = vpack.c.bf16 %v356_v10, %v351_v9  ;;  %v239_v14 = vld [vmem:[%s392_s3] ss:$0 sm:$0xff] }
   0x6   :  { %v197_v22 = vmul.u32 128, %v189_v15  ;;  %v198_v23 = vadd.s32 %v196_v18, %v194_v17 }
   0x8   :  { %v199_v30 = vadd.s32 %v197_v22, %v194_v17  ;;  %v200_v31 = vmul.u32 2654435761, %v198_v23 }
   0xa   :  { %262 = vmatpush3.bf16.xpose.msra.mxu0 %v282_v2  ;;  %v201_v36 = vmul.u32 2654435761, %v199_v30  ;;  %v203_v37 = vadd.s32 %v202_v33, %v200_v31 }
   0xb   :  { %263 = vmatprep.subr.bf16.mxu0 %v297_v0 }
   0xc   :  { %v204_v39 = vadd.s32 %v202_v33, %v201_v36  ;;  %v205_v40 = vshrl.u32 %v203_v37, 16 }
   0xe   :  { %v206_v42 = vshrl.u32 %v204_v39, 16  ;;  %v207_v43 = vxor.u32 %v205_v40, %v203_v37 }
  0x10   :  { %v208_v46 = vxor.u32 %v206_v42, %v204_v39  ;;  %v209_v48 = vmul.u32 2246822507, %v207_v43 }
  0x12   :  { %264 = vmatpush3.bf16.xpose.msra.mxu0 %v283_v3  ;;  %v210_v53 = vmul.u32 2246822507, %v208_v46  ;;  %v211_v55 = vshrl.u32 %v209_v48, 13 }
  0x13   :  { %265 = vmatprep.subr.bf16.mxu0 %v297_v0 }
  0x14   :  { %v212_v61 = vshrl.u32 %v210_v53, 13  ;;  %v213_v62 = vxor.u32 %v211_v55, %v209_v48 }
  0x16   :  { %v214_v3 = vxor.u32 %v212_v61, %v210_v53 }
  0x1a   :  { %266 = vmatpush3.bf16.xpose.msra.mxu0 %v284_v4  ;;  %v215_v4 = vmul.u32 3266489909, %v213_v62 }
  0x1b   :  { %267 = vmatprep.subr.bf16.mxu0 %v297_v0 }
  0x1c   :  { %v217_v12 = vshrl.u32 %v215_v4, 16 }
  0x22   :  { %268 = vmatpush3.bf16.xpose.msra.mxu0 %v285_v5 }
  0x23   :  { %269 = vmatprep.subr.bf16.mxu0 %v297_v0 }
  0x2a   :  { %270 = vmatpush3.bf16.xpose.msra.mxu0 %v286_v6 }
  0x2b   :  { %271 = vmatprep.subr.bf16.mxu0 %v297_v0 }
  0x32   :  { %272 = vmatpush3.bf16.xpose.msra.mxu0 %v287_v7 }
  0x33   :  { %273 = vmatprep.subr.bf16.mxu0 %v297_v0 }
  0x3a   :  { %274 = vmatpush3.bf16.xpose.msra.mxu0 %v288_v8 }
  0x41   :  { %276 = vmatmul.mubr.bf16.vlgmr.msra.gmra.mxu0 %v19_v11  ;;  %v216_v11 = vmul.u32 3266489909, %v214_v3 }
  0x43   :  { %v218_v18 = vshrl.u32 %v216_v11, 16 }
  0x45   :  { %v220_v30 = vxor.u32 %v218_v18, %v216_v11 }
  0x47   :  { %vm222_vm6 = vcmp.lt.s32.totalorder %v220_v30, 0  ;;  %vm224_vm7 = vcmp.ge.s32.totalorder %v220_v30, 429496730 }
  0x48   :  { %vm226_vm8 = vmor %vm222_vm6, %vm224_vm7 }
 0x101   :  { %v125_v16 = vpop.f32.mrf.mxu0 }
 0x102   :  { %v363_v19 = vadd.f32 %v239_v14, %v125_v16 }
 0x103   :  { %v277_v20 = vpop.f32.mrf.mxu0 }
 0x104   :  { %v366_v21 = vmul.f32 0.70710677, %v363_v19  ;;  %v219_v20 = vxor.u32 %v217_v12, %v215_v4  ;;  %v132_v31 = vmul.f32 0.5, %v363_v19 }
 0x105   :  { %v128_v24 = vpop.f32.mrf.mxu0 }
 0x106   :  { %v136_v25 = vand.u32 2147483647, %v366_v21  ;;  %v369_v26 = vadd.f32 %v239_v14, %v128_v24  ;;  %vm174_vm1 = vcmp.lt.f32.partialorder %v366_v21, 0.0  ;;  %vm221_vm2 = vcmp.lt.s32.totalorder %v219_v20, 0 }
 0x107   :  { %v278_v27 = vpop.f32.mrf.mxu0  ;;  %vm223_vm3 = vcmp.ge.s32.totalorder %v219_v20, 429496730 }
 0x108   :  { %v138_v28 = vmul.f32 0.3275911, %v136_v25  ;;  %v372_v29 = vmul.f32 0.70710677, %v369_v26  ;;  %v164_v41 = vsub.f32 0.0, %v136_v25  ;;  %vm225_vm5 = vmor %vm221_vm2, %vm223_vm3 }
 0x10a   :  { %v140_v32 = vadd.f32 1.0, %v138_v28  ;;  %v137_v34 = vand.u32 2147483647, %v372_v29  ;;  %v166_v44 = vmul.f32 %v164_v41, %v136_v25  ;;  %vm175_vm4 = vcmp.lt.f32.partialorder %v372_v29, 0.0 }
 0x10c   :  { %289 = vrcp.f32 %v140_v32  ;;  %v139_v35 = vmul.f32 0.3275911, %v137_v34  ;;  %v165_v45 = vsub.f32 0.0, %v137_v34  ;;  %v168_v50 = vmul.f32 1.442695, %v166_v44 }
 0x10e   :  { %v141_v38 = vadd.f32 1.0, %v139_v35  ;;  %v167_v51 = vmul.f32 %v165_v45, %v137_v34 }
 0x110   :  { %291 = vrcp.f32 %v141_v38  ;;  %v170_v58 = vmul.f32 1.442695, %v167_v51  ;;  %v133_v38 = vmul.f32 0.5, %v369_v26 }
 0x111   :  { %293 = vpow2.f32 %v168_v50 }
 0x112   :  { %295 = vpow2.f32 %v170_v58 }
 0x119   :  { %v290_v47 = vpop.eup %289 }
 0x11a   :  { %v146_v49 = vmul.f32 1.0614054, %v290_v47 }
 0x11c   :  { %v148_v52 = vadd.f32 -1.4531521, %v146_v49 }
 0x11d   :  { %v292_v54 = vpop.eup %291 }
 0x11e   :  { %v150_v56 = vmul.f32 %v290_v47, %v148_v52  ;;  %v147_v57 = vmul.f32 1.0614054, %v292_v54  ;;  %v294_v15 = vpop.eup %293 }
 0x11f   :  { %v296_v25 = vpop.eup %295 }
 0x120   :  { %v152_v59 = vadd.f32 1.4214138, %v150_v56  ;;  %v149_v60 = vadd.f32 -1.4531521, %v147_v57 }
 0x122   :  { %v154_v63 = vmul.f32 %v290_v47, %v152_v59  ;;  %v151_v0 = vmul.f32 %v292_v54, %v149_v60 }
 0x124   :  { %v156_v1 = vadd.f32 -0.28449672, %v154_v63  ;;  %v153_v2 = vadd.f32 1.4214138, %v151_v0 }
 0x126   :  { %v158_v5 = vmul.f32 %v290_v47, %v156_v1  ;;  %v155_v6 = vmul.f32 %v292_v54, %v153_v2 }
 0x128   :  { %v160_v7 = vadd.f32 0.2548296, %v158_v5  ;;  %v157_v8 = vadd.f32 -0.28449672, %v155_v6 }
 0x12a   :  { %v162_v13 = vmul.f32 %v290_v47, %v160_v7  ;;  %v159_v14 = vmul.f32 %v292_v54, %v157_v8 }
 0x12c   :  { %v172_v16 = vmul.f32 %v294_v15, %v162_v13  ;;  %v161_v17 = vadd.f32 0.2548296, %v159_v14 }
 0x12e   :  { %v248_v22 = vadd.f32 -1.0, %v172_v16  ;;  %v178_v23 = vsub.f32 1.0, %v172_v16  ;;  %v163_v24 = vmul.f32 %v292_v54, %v161_v17 }
 0x130   :  { %v180_v27 = vsel %vm174_vm1, %v248_v22, %v178_v23  ;;  %v173_v28 = vmul.f32 %v296_v25, %v163_v24 }
 0x131   :  { %v182_v32 = vadd.f32 1.0, %v180_v27 }
 0x132   :  { %v249_v33 = vadd.f32 -1.0, %v173_v28  ;;  %v179_v34 = vsub.f32 1.0, %v173_v28 }
 0x133   :  { %v184_v35 = vmul.f32 %v182_v32, %v132_v31 }
 0x134   :  { %v181_v36 = vsel %vm175_vm4, %v249_v33, %v179_v34 }
 0x135   :  { %v227_v37 = vmul.f32 1.1111112, %v184_v35  ;;  %v183_v21 = vadd.f32 1.0, %v181_v36 }
 0x137   :  { %v229_v39 = vsel %vm225_vm5, %v227_v37, 0.0  ;;  %v185_v40 = vmul.f32 %v183_v21, %v133_v38 }
 0x138   :  { %v231_v19 = vadd.f32 %v229_v39, %v351_v9 }
 0x139   :  { %v228_v41 = vmul.f32 1.1111112, %v185_v40 }
 0x13a   :  { %233 = vst [vmem:[%s394_s4] sm:$0xff] %v231_v19 }
 0x13b   :  { %v230_v42 = vsel %vm226_vm8, %v228_v41, 0.0 }
 0x13c   :  { %v232_v29 = vadd.f32 %v230_v42, %v356_v10 }
 0x13e   :  { %234 = vst [vmem:[%s394_s4 + $0x8] sm:$0xff] %v232_v29 }

</bundles_post_ra>
